<compile_context>
chip_gen: v6e
topology: v6e:2x2x1
jax: 0.10.0
libtpu: 0.0.40
codegen_flags: <defaults>
</compile_context>

<pallas_src>
import jax
import jax.numpy as jnp
from jax.experimental import pallas as pl
from jax.experimental.pallas import tpu as pltpu

EPS = 1e-12


def _round_up(v, m):
    return (v + m - 1) // m * m


def _layer_norm(x, gamma, beta):
    # One-pass formulation: two independent cross-lane reductions (sum and
    # sum-of-squares) instead of mean -> mean((x - mu)^2).
    inv_d = 1.0 / x.shape[-1]
    s = jnp.sum(x, axis=-1, keepdims=True)
    sq = jnp.sum(x * x, axis=-1, keepdims=True)
    mu = s * inv_d
    var = jnp.maximum(sq * inv_d - mu * mu, 0.0)
    return (x - mu) * jax.lax.rsqrt(var + EPS) * gamma + beta


def uniter_image_emb_kernel(
    x_ref,          # (TM, img_dim)  native dtype
    mask_ref,       # (TM, 1) f32: 1.0 where img_masks != 0 else 0.0
    pos_ref,        # (TM, pos_dim)  native dtype
    w_img_ref, b_img_ref, mrow_ref, g_img_ref, be_img_ref,   # img branch
    w_pos_ref, b_pos_ref, g_pos_ref, be_pos_ref,             # pos branch
    w_out_ref, b_out_ref, g_out_ref, be_out_ref,             # output projection
    o_ref,          # (TM, clip_dim) f32
):
    # img branch: Linear (bf16 operands, f32 accumulate) + mask-row fold + LN.
    img_h = jnp.dot(x_ref[...].astype(jnp.bfloat16), w_img_ref[...],
                    preferred_element_type=jnp.float32)
    img_h = img_h + b_img_ref[...] + mask_ref[...] * mrow_ref[...]
    img_h = _layer_norm(img_h, g_img_ref[...], be_img_ref[...])

    # pos branch: Linear + LayerNorm.
    pos_h = jnp.dot(pos_ref[...].astype(jnp.bfloat16), w_pos_ref[...],
                    preferred_element_type=jnp.float32) + b_pos_ref[...]
    pos_h = _layer_norm(pos_h, g_pos_ref[...], be_pos_ref[...])

    emb = img_h + pos_h

    # output projection to clip_dim + LayerNorm.
    out = jnp.dot(emb.astype(jnp.bfloat16), w_out_ref[...],
                  preferred_element_type=jnp.float32) + b_out_ref[...]
    out = _layer_norm(out, g_out_ref[...], be_out_ref[...])

    o_ref[...] = out.astype(o_ref.dtype)


def uniter_image_embeddings(img_feats, img_pos_feats, params, img_masks=None,
                            *, tm=256):
    """img_feats (B,N,img_dim), img_pos_feats (B,N,pos_dim), img_masks (B,N) int or None."""
    B, N, img_dim = img_feats.shape
    pos_dim = img_pos_feats.shape[-1]
    hidden = params["w_img"].shape[1]
    clip_dim = params["w_out"].shape[1]
    M = B * N

    # Keep activations in their native dtype (no wrapper upcast — halves HBM
    # traffic when the model runs in bf16); casts happen inside the kernel.
    x = img_feats.reshape(M, img_dim)
    pos = img_pos_feats.reshape(M, pos_dim)
    if img_masks is None:
        mask_f = jnp.zeros((M, 1), jnp.float32)
    else:
        mask_f = (img_masks.reshape(M, 1) != 0).astype(jnp.float32)
    # TODO(synk): the (TM,1) mask block is lane-padded to 128 in VMEM; cheap
    # here, but for very tight VMEM it could be packed into the x tile instead.

    # Tile size over M: multiple of 8, capped by the (padded) problem size.
    TM = max(8, min(_round_up(tm, 8), _round_up(M, 8)))
    Mp = _round_up(M, TM)
    if Mp != M:
        pad = Mp - M
        x = jnp.pad(x, ((0, pad), (0, 0)))
        pos = jnp.pad(pos, ((0, pad), (0, 0)))
        mask_f = jnp.pad(mask_f, ((0, pad), (0, 0)))

    # Weights pre-cast to bf16 for the MXU (halves resident VMEM + DMA bytes);
    # biases / LN params stay f32 (used on the f32 accumulator path).
    wb = lambda v: v.astype(jnp.bfloat16)
    row = lambda v: v.reshape(1, -1).astype(jnp.float32)
    # Fold the mask-embedding row through the img projection (f32, tiny).
    mrow_h = (params["mask_emb"][1].astype(jnp.float32)
              @ params["w_img"].astype(jnp.float32)).reshape(1, hidden)

    inputs = (
        x, mask_f, pos,
        wb(params["w_img"]), row(params["b_img"]), mrow_h,
        row(params["g_img"]), row(params["be_img"]),
        wb(params["w_pos"]), row(params["b_pos"]),
        row(params["g_pos"]), row(params["be_pos"]),
        wb(params["w_out"]), row(params["b_out"]),
        row(params["g_out"]), row(params["be_out"]),
    )

    grid = (Mp // TM,)

    tile = lambda r, c: pl.BlockSpec((r, c), lambda i: (i, 0))     # tiled over M
    const = lambda shape: pl.BlockSpec(shape, lambda i: (0, 0))    # VMEM-resident

    in_specs = [
        tile(TM, img_dim),                # x
        tile(TM, 1),                      # mask
        tile(TM, pos_dim),                # pos
        const((img_dim, hidden)), const((1, hidden)), const((1, hidden)),
        const((1, hidden)), const((1, hidden)),
        const((pos_dim, hidden)), const((1, hidden)),
        const((1, hidden)), const((1, hidden)),
        const((hidden, clip_dim)), const((1, clip_dim)),
        const((1, clip_dim)), const((1, clip_dim)),
    ]
    out_specs = pl.BlockSpec((TM, clip_dim), lambda i: (i, 0))

    # VMEM budget: resident params (x2 buffering slack) + double-buffered
    # activation tiles + headroom.  Mask tile accounted at its lane-padded size.
    resident_bytes = sum(int(a.size) * a.dtype.itemsize for a in inputs[3:])
    tile_in_bytes = TM * (img_dim * x.dtype.itemsize
                          + pos_dim * pos.dtype.itemsize
                          + 128 * 4)
    tile_out_bytes = TM * clip_dim * 4
    vmem_limit = int(2 * resident_bytes
                     + 2 * (tile_in_bytes + tile_out_bytes)
                     + (8 << 20))
    vmem_limit = min(vmem_limit, 100 * 1024 * 1024)

    out = pl.pallas_call(
        uniter_image_emb_kernel,
        out_shape=jax.ShapeDtypeStruct((Mp, clip_dim), jnp.float32),
        grid=grid,
        in_specs=in_specs,
        out_specs=out_specs,
        compiler_params=pltpu.CompilerParams(
            dimension_semantics=("parallel",),
            vmem_limit_bytes=vmem_limit,
        ),
    )(*inputs)
    return out[:M].reshape(B, N, clip_dim)


def make_params(key, img_dim, pos_dim, hidden, clip_dim):
    ks = jax.random.split(key, 8)
    p = {
        # nn.Linear weight is (out, in); store transposed (in, out) for x @ W.
        "w_img": jax.random.normal(ks[0], (img_dim, hidden), jnp.float32) * 0.02,
        "b_img": jax.random.normal(ks[1], (hidden,), jnp.float32) * 0.02,
        "g_img": jnp.ones((hidden,), jnp.float32),
        "be_img": jnp.zeros((hidden,), jnp.float32),
        "w_pos": jax.random.normal(ks[2], (pos_dim, hidden), jnp.float32) * 0.02,
        "b_pos": jax.random.normal(ks[3], (hidden,), jnp.float32) * 0.02,
        "g_pos": jnp.ones((hidden,), jnp.float32),
        "be_pos": jnp.zeros((hidden,), jnp.float32),
        "w_out": jax.random.normal(ks[4], (hidden, clip_dim), jnp.float32) * 0.02,
        "b_out": jax.random.normal(ks[5], (clip_dim,), jnp.float32) * 0.02,
        "g_out": jnp.ones((clip_dim,), jnp.float32),
        "be_out": jnp.zeros((clip_dim,), jnp.float32),
        # nn.Embedding(2, img_dim, padding_idx=0); row 0 zeroed in forward.
        "mask_emb": jnp.concatenate(
            [jnp.zeros((1, img_dim), jnp.float32),
             jax.random.normal(ks[6], (1, img_dim), jnp.float32) * 0.02],
            axis=0),
    }
    return p


def reference(img_feats, img_pos_feats, params, img_masks=None):
    """Plain-JAX f32 reference matching the PyTorch forward."""
    if img_masks is not None:
        mask = params["mask_emb"][img_masks.astype(jnp.int32)]
        img_feats = img_feats + mask

    def ln(x, g, b):
        mu = jnp.mean(x, -1, keepdims=True)
        var = jnp.mean((x - mu) ** 2, -1, keepdims=True)
        return (x - mu) / jnp.sqrt(var + EPS) * g + b

    t_img = ln(img_feats @ params["w_img"] + params["b_img"],
               params["g_img"], params["be_img"])
    t_pos = ln(img_pos_feats @ params["w_pos"] + params["b_pos"],
               params["g_pos"], params["be_pos"])
    emb = t_img + t_pos
    emb = emb @ params["w_out"] + params["b_out"]
    return ln(emb, params["g_out"], params["be_out"])


if __name__ == "__main__":
    B, N = 2, 8
    img_dim, pos_dim, hidden, clip_dim = 32, 8, 32, 32

    key = jax.random.PRNGKey(0)
    k_params, k_img, k_pos, k_mask = jax.random.split(key, 4)

    params = make_params(k_params, img_dim, pos_dim, hidden, clip_dim)
    img_feats = jax.random.normal(k_img, (B, N, img_dim), jnp.float32)
    img_pos_feats = jax.random.normal(k_pos, (B, N, pos_dim), jnp.float32)
    img_masks = (jax.random.uniform(k_mask, (B, N)) > 0.5).astype(jnp.int32)

    out = uniter_image_embeddings(img_feats, img_pos_feats, params, img_masks)
    out = jax.block_until_ready(out)

    ref = reference(img_feats, img_pos_feats, params, img_masks)
    assert out.shape == (B, N, clip_dim)
    # bf16 matmul operands (f32 accumulation) -> slightly looser tolerance
    # than a pure-f32 comparison.
    assert jnp.allclose(out, ref, atol=5e-2, rtol=5e-2), "mismatch vs reference"

    print("KERNEL_OK")
</pallas_src>

<mosaic_0001>
module attributes {stable_mosaic.version = 11 : i64} {
  func.func @uniter_image_emb_kernel(%arg0: i32, %arg1: memref<16x32xf32, #tpu.memory_space<vmem>>, %arg2: memref<16x1xf32, #tpu.memory_space<vmem>>, %arg3: memref<16x8xf32, #tpu.memory_space<vmem>>, %arg4: memref<32x32xbf16, #tpu.memory_space<vmem>>, %arg5: memref<1x32xf32, #tpu.memory_space<vmem>>, %arg6: memref<1x32xf32, #tpu.memory_space<vmem>>, %arg7: memref<1x32xf32, #tpu.memory_space<vmem>>, %arg8: memref<1x32xf32, #tpu.memory_space<vmem>>, %arg9: memref<8x32xbf16, #tpu.memory_space<vmem>>, %arg10: memref<1x32xf32, #tpu.memory_space<vmem>>, %arg11: memref<1x32xf32, #tpu.memory_space<vmem>>, %arg12: memref<1x32xf32, #tpu.memory_space<vmem>>, %arg13: memref<32x32xbf16, #tpu.memory_space<vmem>>, %arg14: memref<1x32xf32, #tpu.memory_space<vmem>>, %arg15: memref<1x32xf32, #tpu.memory_space<vmem>>, %arg16: memref<1x32xf32, #tpu.memory_space<vmem>>, %arg17: memref<16x32xf32, #tpu.memory_space<vmem>>) attributes {dimension_semantics = [#tpu.dimension_semantics<parallel>], iteration_bounds = array<i64: 1>, scalar_prefetch = 0 : i64, scratch_operands = 0 : i64, tpu.core_type = #tpu.core_type<tc>, window_params = [{transform_indices = @transform_0, window_bounds = array<i64: 16, 32>}, {transform_indices = @transform_1, window_bounds = array<i64: 16, 1>}, {transform_indices = @transform_2, window_bounds = array<i64: 16, 8>}, {pipeline_mode = #tpu.pipeline_mode<synchronous>, transform_indices = @transform_3, window_bounds = array<i64: 32, 32>}, {pipeline_mode = #tpu.pipeline_mode<synchronous>, transform_indices = @transform_4, window_bounds = array<i64: 1, 32>}, {pipeline_mode = #tpu.pipeline_mode<synchronous>, transform_indices = @transform_5, window_bounds = array<i64: 1, 32>}, {pipeline_mode = #tpu.pipeline_mode<synchronous>, transform_indices = @transform_6, window_bounds = array<i64: 1, 32>}, {pipeline_mode = #tpu.pipeline_mode<synchronous>, transform_indices = @transform_7, window_bounds = array<i64: 1, 32>}, {pipeline_mode = #tpu.pipeline_mode<synchronous>, transform_indices = @transform_8, window_bounds = array<i64: 8, 32>}, {pipeline_mode = #tpu.pipeline_mode<synchronous>, transform_indices = @transform_9, window_bounds = array<i64: 1, 32>}, {pipeline_mode = #tpu.pipeline_mode<synchronous>, transform_indices = @transform_10, window_bounds = array<i64: 1, 32>}, {pipeline_mode = #tpu.pipeline_mode<synchronous>, transform_indices = @transform_11, window_bounds = array<i64: 1, 32>}, {pipeline_mode = #tpu.pipeline_mode<synchronous>, transform_indices = @transform_12, window_bounds = array<i64: 32, 32>}, {pipeline_mode = #tpu.pipeline_mode<synchronous>, transform_indices = @transform_13, window_bounds = array<i64: 1, 32>}, {pipeline_mode = #tpu.pipeline_mode<synchronous>, transform_indices = @transform_14, window_bounds = array<i64: 1, 32>}, {pipeline_mode = #tpu.pipeline_mode<synchronous>, transform_indices = @transform_15, window_bounds = array<i64: 1, 32>}, {transform_indices = @transform_16, window_bounds = array<i64: 16, 32>}]} {
    %c0 = arith.constant 0 : index
    %c0_0 = arith.constant 0 : index
    %0 = vector.load %arg1[%c0, %c0_0] : memref<16x32xf32, #tpu.memory_space<vmem>>, vector<16x32xf32>
    %1 = arith.truncf %0 : vector<16x32xf32> to vector<16x32xbf16>
    %c0_1 = arith.constant 0 : index
    %c0_2 = arith.constant 0 : index
    %2 = vector.load %arg4[%c0_1, %c0_2] : memref<32x32xbf16, #tpu.memory_space<vmem>>, vector<32x32xbf16>
    %cst = arith.constant dense<0.000000e+00> : vector<16x32xf32>
    %3 = tpu.matmul %1, %2, %cst {dimension_numbers = #tpu.dot_dimension_numbers<[1], [0], [0], [1], [0, 0, 1, 1], [], []>} : vector<16x32xbf16>, vector<32x32xbf16>, vector<16x32xf32> -> vector<16x32xf32>
    %c0_3 = arith.constant 0 : index
    %c0_4 = arith.constant 0 : index
    %4 = vector.load %arg5[%c0_3, %c0_4] : memref<1x32xf32, #tpu.memory_space<vmem>>, vector<1x32xf32>
    %5 = vector.broadcast %4 : vector<1x32xf32> to vector<16x32xf32>
    %6 = arith.addf %3, %5 : vector<16x32xf32>
    %c0_5 = arith.constant 0 : index
    %c0_6 = arith.constant 0 : index
    %7 = vector.load %arg2[%c0_5, %c0_6] : memref<16x1xf32, #tpu.memory_space<vmem>>, vector<16x1xf32>
    %c0_7 = arith.constant 0 : index
    %c0_8 = arith.constant 0 : index
    %8 = vector.load %arg6[%c0_7, %c0_8] : memref<1x32xf32, #tpu.memory_space<vmem>>, vector<1x32xf32>
    %9 = vector.broadcast %7 : vector<16x1xf32> to vector<16x32xf32>
    %10 = vector.broadcast %8 : vector<1x32xf32> to vector<16x32xf32>
    %11 = arith.mulf %9, %10 : vector<16x32xf32>
    %12 = arith.addf %6, %11 : vector<16x32xf32>
    %c0_9 = arith.constant 0 : index
    %c0_10 = arith.constant 0 : index
    %13 = vector.load %arg7[%c0_9, %c0_10] : memref<1x32xf32, #tpu.memory_space<vmem>>, vector<1x32xf32>
    %c0_11 = arith.constant 0 : index
    %c0_12 = arith.constant 0 : index
    %14 = vector.load %arg8[%c0_11, %c0_12] : memref<1x32xf32, #tpu.memory_space<vmem>>, vector<1x32xf32>
    %cst_13 = arith.constant dense<0.000000e+00> : vector<16xf32>
    %15 = vector.multi_reduction <add>, %12, %cst_13 [1] : vector<16x32xf32> to vector<16xf32>
    %16 = vector.shape_cast %15 : vector<16xf32> to vector<16x1xf32>
    %17 = arith.mulf %12, %12 : vector<16x32xf32>
    %cst_14 = arith.constant dense<0.000000e+00> : vector<16xf32>
    %18 = vector.multi_reduction <add>, %17, %cst_14 [1] : vector<16x32xf32> to vector<16xf32>
    %19 = vector.shape_cast %18 : vector<16xf32> to vector<16x1xf32>
    %cst_15 = arith.constant 3.125000e-02 : f32
    %20 = vector.broadcast %cst_15 : f32 to vector<16x1xf32>
    %21 = arith.mulf %16, %20 : vector<16x1xf32>
    %cst_16 = arith.constant 3.125000e-02 : f32
    %22 = vector.broadcast %cst_16 : f32 to vector<16x1xf32>
    %23 = arith.mulf %19, %22 : vector<16x1xf32>
    %24 = arith.mulf %21, %21 : vector<16x1xf32>
    %25 = arith.subf %23, %24 : vector<16x1xf32>
    %cst_17 = arith.constant 0.000000e+00 : f32
    %26 = vector.broadcast %cst_17 : f32 to vector<16x1xf32>
    %27 = arith.maximumf %25, %26 : vector<16x1xf32>
    %28 = vector.broadcast %21 : vector<16x1xf32> to vector<16x32xf32>
    %29 = arith.subf %12, %28 : vector<16x32xf32>
    %cst_18 = arith.constant 9.99999996E-13 : f32
    %30 = vector.broadcast %cst_18 : f32 to vector<16x1xf32>
    %31 = arith.addf %27, %30 : vector<16x1xf32>
    %32 = math.rsqrt %31 : vector<16x1xf32>
    %33 = vector.broadcast %32 : vector<16x1xf32> to vector<16x32xf32>
    %34 = arith.mulf %29, %33 : vector<16x32xf32>
    %35 = vector.broadcast %13 : vector<1x32xf32> to vector<16x32xf32>
    %36 = arith.mulf %34, %35 : vector<16x32xf32>
    %37 = vector.broadcast %14 : vector<1x32xf32> to vector<16x32xf32>
    %38 = arith.addf %36, %37 : vector<16x32xf32>
    %c0_19 = arith.constant 0 : index
    %c0_20 = arith.constant 0 : index
    %39 = vector.load %arg3[%c0_19, %c0_20] : memref<16x8xf32, #tpu.memory_space<vmem>>, vector<16x8xf32>
    %40 = arith.truncf %39 : vector<16x8xf32> to vector<16x8xbf16>
    %c0_21 = arith.constant 0 : index
    %c0_22 = arith.constant 0 : index
    %41 = vector.load %arg9[%c0_21, %c0_22] : memref<8x32xbf16, #tpu.memory_space<vmem>>, vector<8x32xbf16>
    %cst_23 = arith.constant dense<0.000000e+00> : vector<16x32xf32>
    %42 = tpu.matmul %40, %41, %cst_23 {dimension_numbers = #tpu.dot_dimension_numbers<[1], [0], [0], [1], [0, 0, 1, 1], [], []>} : vector<16x8xbf16>, vector<8x32xbf16>, vector<16x32xf32> -> vector<16x32xf32>
    %c0_24 = arith.constant 0 : index
    %c0_25 = arith.constant 0 : index
    %43 = vector.load %arg10[%c0_24, %c0_25] : memref<1x32xf32, #tpu.memory_space<vmem>>, vector<1x32xf32>
    %44 = vector.broadcast %43 : vector<1x32xf32> to vector<16x32xf32>
    %45 = arith.addf %42, %44 : vector<16x32xf32>
    %c0_26 = arith.constant 0 : index
    %c0_27 = arith.constant 0 : index
    %46 = vector.load %arg11[%c0_26, %c0_27] : memref<1x32xf32, #tpu.memory_space<vmem>>, vector<1x32xf32>
    %c0_28 = arith.constant 0 : index
    %c0_29 = arith.constant 0 : index
    %47 = vector.load %arg12[%c0_28, %c0_29] : memref<1x32xf32, #tpu.memory_space<vmem>>, vector<1x32xf32>
    %cst_30 = arith.constant dense<0.000000e+00> : vector<16xf32>
    %48 = vector.multi_reduction <add>, %45, %cst_30 [1] : vector<16x32xf32> to vector<16xf32>
    %49 = vector.shape_cast %48 : vector<16xf32> to vector<16x1xf32>
    %50 = arith.mulf %45, %45 : vector<16x32xf32>
    %cst_31 = arith.constant dense<0.000000e+00> : vector<16xf32>
    %51 = vector.multi_reduction <add>, %50, %cst_31 [1] : vector<16x32xf32> to vector<16xf32>
    %52 = vector.shape_cast %51 : vector<16xf32> to vector<16x1xf32>
    %cst_32 = arith.constant 3.125000e-02 : f32
    %53 = vector.broadcast %cst_32 : f32 to vector<16x1xf32>
    %54 = arith.mulf %49, %53 : vector<16x1xf32>
    %cst_33 = arith.constant 3.125000e-02 : f32
    %55 = vector.broadcast %cst_33 : f32 to vector<16x1xf32>
    %56 = arith.mulf %52, %55 : vector<16x1xf32>
    %57 = arith.mulf %54, %54 : vector<16x1xf32>
    %58 = arith.subf %56, %57 : vector<16x1xf32>
    %cst_34 = arith.constant 0.000000e+00 : f32
    %59 = vector.broadcast %cst_34 : f32 to vector<16x1xf32>
    %60 = arith.maximumf %58, %59 : vector<16x1xf32>
    %61 = vector.broadcast %54 : vector<16x1xf32> to vector<16x32xf32>
    %62 = arith.subf %45, %61 : vector<16x32xf32>
    %cst_35 = arith.constant 9.99999996E-13 : f32
    %63 = vector.broadcast %cst_35 : f32 to vector<16x1xf32>
    %64 = arith.addf %60, %63 : vector<16x1xf32>
    %65 = math.rsqrt %64 : vector<16x1xf32>
    %66 = vector.broadcast %65 : vector<16x1xf32> to vector<16x32xf32>
    %67 = arith.mulf %62, %66 : vector<16x32xf32>
    %68 = vector.broadcast %46 : vector<1x32xf32> to vector<16x32xf32>
    %69 = arith.mulf %67, %68 : vector<16x32xf32>
    %70 = vector.broadcast %47 : vector<1x32xf32> to vector<16x32xf32>
    %71 = arith.addf %69, %70 : vector<16x32xf32>
    %72 = arith.addf %38, %71 : vector<16x32xf32>
    %73 = arith.truncf %72 : vector<16x32xf32> to vector<16x32xbf16>
    %c0_36 = arith.constant 0 : index
    %c0_37 = arith.constant 0 : index
    %74 = vector.load %arg13[%c0_36, %c0_37] : memref<32x32xbf16, #tpu.memory_space<vmem>>, vector<32x32xbf16>
    %cst_38 = arith.constant dense<0.000000e+00> : vector<16x32xf32>
    %75 = tpu.matmul %73, %74, %cst_38 {dimension_numbers = #tpu.dot_dimension_numbers<[1], [0], [0], [1], [0, 0, 1, 1], [], []>} : vector<16x32xbf16>, vector<32x32xbf16>, vector<16x32xf32> -> vector<16x32xf32>
    %c0_39 = arith.constant 0 : index
    %c0_40 = arith.constant 0 : index
    %76 = vector.load %arg14[%c0_39, %c0_40] : memref<1x32xf32, #tpu.memory_space<vmem>>, vector<1x32xf32>
    %77 = vector.broadcast %76 : vector<1x32xf32> to vector<16x32xf32>
    %78 = arith.addf %75, %77 : vector<16x32xf32>
    %c0_41 = arith.constant 0 : index
    %c0_42 = arith.constant 0 : index
    %79 = vector.load %arg15[%c0_41, %c0_42] : memref<1x32xf32, #tpu.memory_space<vmem>>, vector<1x32xf32>
    %c0_43 = arith.constant 0 : index
    %c0_44 = arith.constant 0 : index
    %80 = vector.load %arg16[%c0_43, %c0_44] : memref<1x32xf32, #tpu.memory_space<vmem>>, vector<1x32xf32>
    %cst_45 = arith.constant dense<0.000000e+00> : vector<16xf32>
    %81 = vector.multi_reduction <add>, %78, %cst_45 [1] : vector<16x32xf32> to vector<16xf32>
    %82 = vector.shape_cast %81 : vector<16xf32> to vector<16x1xf32>
    %83 = arith.mulf %78, %78 : vector<16x32xf32>
    %cst_46 = arith.constant dense<0.000000e+00> : vector<16xf32>
    %84 = vector.multi_reduction <add>, %83, %cst_46 [1] : vector<16x32xf32> to vector<16xf32>
    %85 = vector.shape_cast %84 : vector<16xf32> to vector<16x1xf32>
    %cst_47 = arith.constant 3.125000e-02 : f32
    %86 = vector.broadcast %cst_47 : f32 to vector<16x1xf32>
    %87 = arith.mulf %82, %86 : vector<16x1xf32>
    %cst_48 = arith.constant 3.125000e-02 : f32
    %88 = vector.broadcast %cst_48 : f32 to vector<16x1xf32>
    %89 = arith.mulf %85, %88 : vector<16x1xf32>
    %90 = arith.mulf %87, %87 : vector<16x1xf32>
    %91 = arith.subf %89, %90 : vector<16x1xf32>
    %cst_49 = arith.constant 0.000000e+00 : f32
    %92 = vector.broadcast %cst_49 : f32 to vector<16x1xf32>
    %93 = arith.maximumf %91, %92 : vector<16x1xf32>
    %94 = vector.broadcast %87 : vector<16x1xf32> to vector<16x32xf32>
    %95 = arith.subf %78, %94 : vector<16x32xf32>
    %cst_50 = arith.constant 9.99999996E-13 : f32
    %96 = vector.broadcast %cst_50 : f32 to vector<16x1xf32>
    %97 = arith.addf %93, %96 : vector<16x1xf32>
    %98 = math.rsqrt %97 : vector<16x1xf32>
    %99 = vector.broadcast %98 : vector<16x1xf32> to vector<16x32xf32>
    %100 = arith.mulf %95, %99 : vector<16x32xf32>
    %101 = vector.broadcast %79 : vector<1x32xf32> to vector<16x32xf32>
    %102 = arith.mulf %100, %101 : vector<16x32xf32>
    %103 = vector.broadcast %80 : vector<1x32xf32> to vector<16x32xf32>
    %104 = arith.addf %102, %103 : vector<16x32xf32>
    %c0_51 = arith.constant 0 : index
    %c0_52 = arith.constant 0 : index
    %105 = vector.load %arg17[%c0_51, %c0_52] : memref<16x32xf32, #tpu.memory_space<vmem>>, vector<16x32xf32>
    tpu.vector_store %arg17[%c0_51, %c0_52], %104 {strides = array<i32>} : memref<16x32xf32, #tpu.memory_space<vmem>>, vector<16x32xf32>,
    return
  }
  func.func @transform_0(%arg0: i32) -> (i32, i32) {
    %c0_i32 = arith.constant 0 : i32
    %c0_i32_0 = arith.constant 0 : i32
    return %arg0, %c0_i32 : i32, i32
  }
  func.func @transform_1(%arg0: i32) -> (i32, i32) {
    %c0_i32 = arith.constant 0 : i32
    %c0_i32_0 = arith.constant 0 : i32
    return %arg0, %c0_i32 : i32, i32
  }
  func.func @transform_2(%arg0: i32) -> (i32, i32) {
    %c0_i32 = arith.constant 0 : i32
    %c0_i32_0 = arith.constant 0 : i32
    return %arg0, %c0_i32 : i32, i32
  }
  func.func @transform_3(%arg0: i32) -> (i32, i32) {
    %c0_i32 = arith.constant 0 : i32
    %c0_i32_0 = arith.constant 0 : i32
    %c0_i32_1 = arith.constant 0 : i32
    return %c0_i32, %c0_i32_0 : i32, i32
  }
  func.func @transform_4(%arg0: i32) -> (i32, i32) {
    %c0_i32 = arith.constant 0 : i32
    %c0_i32_0 = arith.constant 0 : i32
    %c0_i32_1 = arith.constant 0 : i32
    return %c0_i32, %c0_i32_0 : i32, i32
  }
  func.func @transform_5(%arg0: i32) -> (i32, i32) {
    %c0_i32 = arith.constant 0 : i32
    %c0_i32_0 = arith.constant 0 : i32
    %c0_i32_1 = arith.constant 0 : i32
    return %c0_i32, %c0_i32_0 : i32, i32
  }
  func.func @transform_6(%arg0: i32) -> (i32, i32) {
    %c0_i32 = arith.constant 0 : i32
    %c0_i32_0 = arith.constant 0 : i32
    %c0_i32_1 = arith.constant 0 : i32
    return %c0_i32, %c0_i32_0 : i32, i32
  }
  func.func @transform_7(%arg0: i32) -> (i32, i32) {
    %c0_i32 = arith.constant 0 : i32
    %c0_i32_0 = arith.constant 0 : i32
    %c0_i32_1 = arith.constant 0 : i32
    return %c0_i32, %c0_i32_0 : i32, i32
  }
  func.func @transform_8(%arg0: i32) -> (i32, i32) {
    %c0_i32 = arith.constant 0 : i32
    %c0_i32_0 = arith.constant 0 : i32
    %c0_i32_1 = arith.constant 0 : i32
    return %c0_i32, %c0_i32_0 : i32, i32
  }
  func.func @transform_9(%arg0: i32) -> (i32, i32) {
    %c0_i32 = arith.constant 0 : i32
    %c0_i32_0 = arith.constant 0 : i32
    %c0_i32_1 = arith.constant 0 : i32
    return %c0_i32, %c0_i32_0 : i32, i32
  }
  func.func @transform_10(%arg0: i32) -> (i32, i32) {
    %c0_i32 = arith.constant 0 : i32
    %c0_i32_0 = arith.constant 0 : i32
    %c0_i32_1 = arith.constant 0 : i32
    return %c0_i32, %c0_i32_0 : i32, i32
  }
  func.func @transform_11(%arg0: i32) -> (i32, i32) {
    %c0_i32 = arith.constant 0 : i32
    %c0_i32_0 = arith.constant 0 : i32
    %c0_i32_1 = arith.constant 0 : i32
    return %c0_i32, %c0_i32_0 : i32, i32
  }
  func.func @transform_12(%arg0: i32) -> (i32, i32) {
    %c0_i32 = arith.constant 0 : i32
    %c0_i32_0 = arith.constant 0 : i32
    %c0_i32_1 = arith.constant 0 : i32
    return %c0_i32, %c0_i32_0 : i32, i32
  }
  func.func @transform_13(%arg0: i32) -> (i32, i32) {
    %c0_i32 = arith.constant 0 : i32
    %c0_i32_0 = arith.constant 0 : i32
    %c0_i32_1 = arith.constant 0 : i32
    return %c0_i32, %c0_i32_0 : i32, i32
  }
  func.func @transform_14(%arg0: i32) -> (i32, i32) {
    %c0_i32 = arith.constant 0 : i32
    %c0_i32_0 = arith.constant 0 : i32
    %c0_i32_1 = arith.constant 0 : i32
    return %c0_i32, %c0_i32_0 : i32, i32
  }
  func.func @transform_15(%arg0: i32) -> (i32, i32) {
    %c0_i32 = arith.constant 0 : i32
    %c0_i32_0 = arith.constant 0 : i32
    %c0_i32_1 = arith.constant 0 : i32
    return %c0_i32, %c0_i32_0 : i32, i32
  }
  func.func @transform_16(%arg0: i32) -> (i32, i32) {
    %c0_i32 = arith.constant 0 : i32
    %c0_i32_0 = arith.constant 0 : i32
    return %arg0, %c0_i32 : i32, i32
  }
}

</mosaic_0001>

<bundles_post_ra>
// kernel: tpu_custom_call.1
= control target key start
LH: loop header
LB: loop body
LE: loop exit
PB: predicated region body
PF: predicated region fallthrough
CT: control target
= control target key end

     0   :  { %s848_s0 = inlined_call_operand.vmem [shape: f32[16,32], index: 0, kind: input, shape index: {}]   ;;  %s849_s1 = inlined_call_operand.vmem [shape: f32[16,1], index: 1, kind: input, shape index: {}]   ;;  %s850_s2 = inlined_call_operand.vmem [shape: f32[16,8], index: 2, kind: input, shape index: {}]   ;;  %s851_s3 = inlined_call_operand.vmem [shape: bf16[32,32], index: 3, kind: input, shape index: {}]   ;;  %s852_s4 = inlined_call_operand.hbm [shape: f32[1,32], index: 4, kind: input, shape index: {}]   ;;  %s853_s5 = inlined_call_operand.vmem [shape: f32[1,32], index: 5, kind: input, shape index: {}]   ;;  %s854_s6 = inlined_call_operand.hbm [shape: f32[1,32], index: 6, kind: input, shape index: {}]   ;;  %s855_s7 = inlined_call_operand.hbm [shape: f32[1,32], index: 7, kind: input, shape index: {}]   ;;  %s856_s8 = inlined_call_operand.vmem [shape: bf16[8,32], index: 8, kind: input, shape index: {}]   ;;  %s857_s9 = inlined_call_operand.vmem [shape: f32[1,32], index: 9, kind: input, shape index: {}]   ;;  %s858_s10 = inlined_call_operand.vmem [shape: f32[1,32], index: 10, kind: input, shape index: {}]   ;;  %s859_s11 = inlined_call_operand.vmem [shape: f32[1,32], index: 11, kind: input, shape index: {}]   ;;  %s860_s12 = inlined_call_operand.vmem [shape: bf16[32,32], index: 12, kind: input, shape index: {}]   ;;  %s861_s13 = inlined_call_operand.vmem [shape: f32[1,32], index: 13, kind: input, shape index: {}]   ;;  %s862_s14 = inlined_call_operand.vmem [shape: f32[1,32], index: 14, kind: input, shape index: {}]   ;;  %s863_s15 = inlined_call_operand.vmem [shape: f32[1,32], index: 15, kind: input, shape index: {}]   ;;  %s864_s16 = inlined_call_operand.hbm [shape: f32[16,32], index: 16, kind: output, shape index: {}]  }
   0x1   :  { %866 = sst [smem:[#allocation12_spill]] %s848_s0 }
   0x2   :  { %21 = vsyncpa [#allocation3], 0 }
   0x3   :  { %22 = vsyncpa [#allocation6], 0 }
   0x4   :  { %23 = vsyncpa [#allocation4], 0  ;;  %s643_s21 = smov [#allocation5]   ;;  %s644_s23 = smov [#allocation2]  }
   0x5   :  { %s50_s22 = sshll.u32 %s643_s21, 4  ;;  %s38_s24 = sshll.u32 %s644_s23, 4  ;;  %s51_s22 = int_to_ptr.vmem [resolvable:$true] %s50_s22  ;;  %s39_s24 = int_to_ptr.vmem [resolvable:$true] %s38_s24 }
   0x6   :  { %s565_s25 = scalar_lea.vmem %s51_s22, 16  ;;  %s569_s26 = scalar_lea.vmem %s51_s22, 32 }
   0x7   :  { %p566_p0 = scmp.ne.s32.totalorder %s51_s22, %s565_s25  ;;  %p570_p1 = scmp.lt.s32.totalorder %s51_s22, %s51_s22 }
   0x8   :  { %p571_p2 = scmp.lt.s32.totalorder %s569_s26, %s565_s25 }
   0xa   :  { %p572_p3 = por %p571_p2, %p570_p1 }
   0xc   :  { %p573_p4 = pnand %p572_p3, %p566_p0 }
   0xe   :  { %576 = shalt.err (!%p573_p4)
}
   0xf   :  { %53 = dma.hbm_to_vmem [thread:$0]  %s854_s6, 16, %s51_s22, [#allocation6]  }
  0x10   :  { %s585_s29 = scalar_lea.vmem %s39_s24, 16  ;;  %s589_s30 = scalar_lea.vmem %s39_s24, 32 }
  0x11   :  { %p586_p5 = scmp.ne.s32.totalorder %s39_s24, %s585_s29  ;;  %p590_p6 = scmp.lt.s32.totalorder %s39_s24, %s39_s24 }
  0x12   :  { %p591_p7 = scmp.lt.s32.totalorder %s589_s30, %s585_s29 }
  0x14   :  { %p592_p8 = por %p591_p7, %p590_p6 }
  0x16   :  { %p593_p9 = pnand %p592_p8, %p586_p5 }
  0x18   :  { %596 = shalt.err (!%p593_p9)
}
  0x19   :  { %41 = dma.hbm_to_vmem [thread:$0]  %s852_s4, 16, %s39_s24, [#allocation3]  }
  0x1a   :  { %s645_s18 = smov [#allocation7]  }
  0x1b   :  { %s60_s19 = sshll.u32 %s645_s18, 4  ;;  %s61_s19 = int_to_ptr.vmem [resolvable:$true] %s60_s19 }
  0x1c   :  { %s605_s20 = scalar_lea.vmem %s61_s19, 16  ;;  %s609_s21 = scalar_lea.vmem %s61_s19, 32 }
  0x1d   :  { %p606_p10 = scmp.ne.s32.totalorder %s61_s19, %s605_s20  ;;  %p610_p11 = scmp.lt.s32.totalorder %s61_s19, %s61_s19 }
  0x1e   :  { %p611_p12 = scmp.lt.s32.totalorder %s609_s21, %s605_s20 }
  0x20   :  { %p612_p13 = por %p611_p12, %p610_p11 }
  0x22   :  { %p613_p0 = pnand %p612_p13, %p606_p10 }
  0x24   :  { %616 = shalt.err (!%p613_p0)
}
  0x25   :  { %63 = dma.hbm_to_vmem [thread:$0]  %s855_s7, 16, %s61_s19, [#allocation6]  }
  0x26   :  { %637 = dma.done.wait [#allocation3], 16  }
  0x27   :  { %638 = vsyncadd [#allocation3], 4294967280 }
  0x28   :  { %639 = dma.done.wait [#allocation6], 32  }
  0x29   :  { %640 = vsyncadd [#allocation6], 4294967264  ;;  %v646_v0 = vmov 0.0   ;;  %vm647_vm0 = vmmov 0   ;;  %v648_v1 = vmov 0   ;;  %vm249_vm1 = vcmask 1043456  }
  0x2a   :  { %517 = vmatprep.subr.bf16.mxu1 %v646_v0  ;;  %509 = vmatprep.subr.bf16.mxu0 %v646_v0  ;;  %v237_v2 = vld [vmem:[%s856_s8] sm:$0xf]  ;;  %v541_v4 = vld [vmem:[%s851_s3 + $0x8] sm:$0xff]   ;;  %vm245_vm2 = vcmask 64512   ;;  %s867_s17 = sld [smem:[#allocation12_spill]]  ;;  %vm116_vm3 = vcmask 261120  }
  0x2b   :  { %519 = vmatprep.mubr.msk.bf16.mxu1 %vm647_vm0, %v646_v0  ;;  %513 = vmatprep.mubr.msk.bf16.mxu0 %vm647_vm0, %v646_v0  ;;  %v251_v3 = vsel %vm249_vm1, %v237_v2, 0  ;;  %v234_v5 = vld [vmem:[%s850_s2] sm:$0xff]  ;;  %v235_v6 = vld [vmem:[%s850_s2 + $0x8] sm:$0xff]  ;;  %s649_s30 = smov [#allocation8]  }
  0x2c   :  { %540 = vset.pattern.permute.xlu0 %v648_v1  ;;  %518 = vmatpush3.bf16.msra.mxu1 %v251_v3  ;;  %v236_v7 = vpack.c.bf16 %v235_v6, %v234_v5  ;;  %v542_v8 = vld [vmem:[%s851_s3] sm:$0xff]   ;;  %v162_v12 = vld [vmem:[%s849_s1 + $0x8] sm:$0xff]  ;;  %s471_s8 = sshll.u32 %s649_s30, 4  ;;  %s472_s8 = int_to_ptr.vmem [resolvable:$true] %s471_s8 }
  0x2d   :  { %510 = vmatpush3.bf16.msra.mxu0 %v541_v4  ;;  %v161_v11 = vld [vmem:[%s849_s1] sm:$0xff]  ;;  %523 = vmatprep.subr.bf16.mxu1 %v646_v0  ;;  %v543_v47 = vld [vmem:[%s860_s12 + $0x8] sm:$0xff]   ;;  %p622_p2 = scmp.lt.s32.totalorder %s472_s8, %s472_s8 }
  0x2e   :  { %511 = vmatprep.subr.bf16.mxu0 %v646_v0  ;;  %166 = vperm.xlu0 %540, %v161_v11   ;;  %v491_v14 = vld [vmem:[%s857_s9] ss:$0 sm:$0xff] }
  0x2f   :  { %520 = vmatmul.mubr.msk.bf16.vlgmr.msra.gmra.mxu1 %vm245_vm2, %v236_v7  ;;  %v488_v17 = vld [vmem:[%s853_s5] ss:$0 sm:$0xff] }
  0x30   :  { %v90_v9 = vld [vmem:[%s867_s17] sm:$0xff]  ;;  %v91_v10 = vld [vmem:[%s867_s17 + $0x8] sm:$0xff]  ;;  %527 = vmatprep.mubr.msk.bf16.mxu1 %vm647_vm0, %v646_v0  ;;  %524 = vmatpush3.bf16.msra.mxu1 %v543_v47 }
  0x31   :  { %v92_v13 = vpack.c.bf16 %v91_v10, %v90_v9  ;;  %512 = vmatpush3.bf16.msra.mxu0 %v542_v8  ;;  %v484_v21 = vld [vmem:[#allocation2] ss:$0 sm:$0xff]  ;;  %525 = vmatprep.subr.bf16.mxu1 %v646_v0 }
  0x32   :  { %171 = vperm.xlu0 %540, %v162_v12   ;;  %v544_v48 = vld [vmem:[%s860_s12] sm:$0xff]  }
  0x34   :  { %514 = vmatmul.mubr.msk.bf16.vlgmr.msra.gmra.mxu0 %vm116_vm3, %v92_v13  ;;  %526 = vmatpush3.bf16.msra.mxu1 %v544_v48 }
  0xa9   :  { %v167_v20 = vpop.permute.xlu0 %166 }
  0xaa   :  { %v180_v24 = vmul.f32 %v488_v17, %v167_v20 }
  0xad   :  { %v172_v34 = vpop.permute.xlu0 %171 }
  0xae   :  { %v181_v37 = vmul.f32 %v488_v17, %v172_v34  ;;  %v490_v34 = vld [vmem:[#allocation7] ss:$0 sm:$0xff] }
  0xef   :  { %v287_v15 = vpop.f32.mrf.mxu1 }
  0xf0   :  { %v787_v16 = vadd.f32 %v491_v14, %v287_v15 }
  0xf1   :  { %v521_v18 = vpop.f32.mrf.mxu1 }
  0xf2   :  { %v296_v19 = vsel %vm116_vm3, %v787_v16, 0.0  ;;  %v302_v22 = vmul.f32 %v787_v16, %v787_v16 }
  0xf3   :  { %v290_v23 = vpop.f32.mrf.mxu1  ;;  %297 = vadd.xlane.f32.xlu0 %v296_v19 }
  0xf4   :  { %v796_v25 = vadd.f32 %v491_v14, %v290_v23  ;;  %v154_v26 = vpop.f32.mrf.mxu0  ;;  %v304_v27 = vsel %vm116_vm3, %v302_v22, 0.0 }
  0xf5   :  { %v155_v28 = vadd.f32 %v484_v21, %v154_v26  ;;  %305 = vadd.xlane.f32.xlu1 %v304_v27  ;;  %v522_v29 = vpop.f32.mrf.mxu1  ;;  %v489_v26 = vld [vmem:[#allocation5] ss:$0 sm:$0xff] }
  0xf6   :  { %v515_v30 = vpop.f32.mrf.mxu0  ;;  %v299_v33 = vsel %vm116_vm3, %v796_v25, 0.0  ;;  %v303_v45 = vmul.f32 %v796_v25, %v796_v25  ;;  %v493_v29 = vld [vmem:[%s858_s10] ss:$0 sm:$0xff] }
  0xf7   :  { %v799_v31 = vadd.f32 %v180_v24, %v155_v28 }
  0xf8   :  { %v157_v32 = vpop.f32.mrf.mxu0  ;;  %v307_v46 = vsel %vm116_vm3, %v303_v45, 0.0 }
  0xf9   :  { %300 = vadd.xlane.f32.xlu1 %v299_v33  ;;  %v186_v36 = vsel %vm116_vm3, %v799_v31, 0.0  ;;  %v158_v38 = vadd.f32 %v484_v21, %v157_v32  ;;  %v192_v39 = vmul.f32 %v799_v31, %v799_v31 }
  0xfa   :  { %v516_v35 = vpop.f32.mrf.mxu0 }
  0xfb   :  { %v183_v40 = vadd.f32 %v181_v37, %v158_v38  ;;  %v194_v41 = vsel %vm116_vm3, %v192_v39, 0.0 }
  0xfd   :  { %187 = vadd.xlane.f32.xlu1 %v186_v36  ;;  %v189_v42 = vsel %vm116_vm3, %v183_v40, 0.0  ;;  %v193_v43 = vmul.f32 %v183_v40, %v183_v40 }
  0xff   :  { %v197_v44 = vsel %vm116_vm3, %v193_v43, 0.0 }
 0x101   :  { %195 = vadd.xlane.f32.xlu1 %v194_v41 }
 0x105   :  { %190 = vadd.xlane.f32.xlu1 %v189_v42 }
 0x109   :  { %198 = vadd.xlane.f32.xlu1 %v197_v44 }
 0x10d   :  { %308 = vadd.xlane.f32.xlu1 %v307_v46 }
 0x17c   :  { %v298_v50 = vpop.xlane.xlu0 %297 }
 0x17d   :  { %v310_v52 = vmul.f32 0.03125, %v298_v50 }
 0x17e   :  { %v306_v49 = vpop.xlane.xlu1 %305 }
 0x17f   :  { %v314_v55 = vmul.f32 %v310_v52, %v310_v52  ;;  %v312_v56 = vmul.f32 0.03125, %v306_v49  ;;  %v320_v21 = vsub.f32 %v787_v16, %v310_v52  ;;  %v494_v16 = vld [vmem:[%s859_s11] ss:$0 sm:$0xff] }
 0x181   :  { %v316_v60 = vsub.f32 %v312_v56, %v314_v55 }
 0x182   :  { %v301_v51 = vpop.xlane.xlu1 %300 }
 0x183   :  { %v318_v2 = vmax.f32 %v316_v60, 0.0  ;;  %v311_v0 = vmul.f32 0.03125, %v301_v51 }
 0x185   :  { %v322_v7 = vadd.f32 1e-12, %v318_v2  ;;  %v315_v10 = vmul.f32 %v311_v0, %v311_v0  ;;  %v321_v30 = vsub.f32 %v796_v25, %v311_v0  ;;  %v495_v25 = vld [vmem:[%s861_s13] ss:$0 sm:$0xff] }
 0x186   :  { %v188_v53 = vpop.xlane.xlu1 %187 }
 0x187   :  { %v200_v54 = vmul.f32 0.03125, %v188_v53 }
 0x189   :  { %v204_v58 = vmul.f32 %v200_v54, %v200_v54  ;;  %v210_v19 = vsub.f32 %v799_v31, %v200_v54 }
 0x18a   :  { %v196_v57 = vpop.xlane.xlu1 %195 }
 0x18b   :  { %v202_v59 = vmul.f32 0.03125, %v196_v57 }
 0x18d   :  { %v206_v61 = vsub.f32 %v202_v59, %v204_v58 }
 0x18e   :  { %v191_v62 = vpop.xlane.xlu1 %190 }
 0x18f   :  { %v208_v63 = vmax.f32 %v206_v61, 0.0  ;;  %v201_v1 = vmul.f32 0.03125, %v191_v62 }
 0x191   :  { %v212_v4 = vadd.f32 1e-12, %v208_v63  ;;  %v205_v5 = vmul.f32 %v201_v1, %v201_v1  ;;  %v211_v23 = vsub.f32 %v183_v40, %v201_v1 }
 0x192   :  { %v199_v3 = vpop.xlane.xlu1 %198 }
 0x193   :  { %v203_v6 = vmul.f32 0.03125, %v199_v3  ;;  %545 = vrsqrt.f32 %v212_v4 }
 0x194   :  { %547 = vrsqrt.f32 %v322_v7 }
 0x195   :  { %v207_v8 = vsub.f32 %v203_v6, %v205_v5 }
 0x196   :  { %v309_v9 = vpop.xlane.xlu1 %308 }
 0x197   :  { %v209_v11 = vmax.f32 %v207_v8, 0.0  ;;  %v313_v12 = vmul.f32 0.03125, %v309_v9 }
 0x199   :  { %v213_v13 = vadd.f32 1e-12, %v209_v11  ;;  %v317_v14 = vsub.f32 %v313_v12, %v315_v10  ;;  %v499_v11 = vld [vmem:[%s862_s14] ss:$0 sm:$0xff]  ;;  %s617_s14 = scalar_lea.vmem %s472_s8, 256 }
 0x19a   :  { %p618_p1 = scmp.ne.s32.totalorder %s472_s8, %s617_s14  ;;  %p623_p3 = scmp.lt.s32.totalorder %s617_s14, %s617_s14 }
 0x19b   :  { %549 = vrsqrt.f32 %v213_v13  ;;  %v319_v15 = vmax.f32 %v317_v14, 0.0 }
 0x19c   :  { %p624_p4 = por %p623_p3, %p622_p2 }
 0x19d   :  { %v323_v17 = vadd.f32 1e-12, %v319_v15  ;;  %v500_v15 = vld [vmem:[%s863_s15] ss:$0 sm:$0xff] }
 0x19e   :  { %p625_p5 = pnand %p624_p4, %p618_p1 }
 0x19f   :  { %551 = vrsqrt.f32 %v323_v17 }
 0x1a0   :  { %v546_v18 = vpop.eup %545 }
 0x1a1   :  { %v548_v20 = vpop.eup %547  ;;  %v216_v22 = vmul.f32 %v546_v18, %v210_v19 }
 0x1a2   :  { %v326_v27 = vmul.f32 %v548_v20, %v320_v21 }
 0x1a3   :  { %v224_v32 = vmul.f32 %v489_v26, %v216_v22 }
 0x1a4   :  { %v334_v36 = vmul.f32 %v493_v29, %v326_v27 }
 0x1a5   :  { %v232_v37 = vadd.f32 %v490_v34, %v224_v32 }
 0x1a6   :  { %v342_v40 = vadd.f32 %v494_v16, %v334_v36 }
 0x1a8   :  { %v550_v24 = vpop.eup %549  ;;  %v344_v42 = vadd.f32 %v342_v40, %v232_v37 }
 0x1a9   :  { %v217_v28 = vmul.f32 %v550_v24, %v211_v23 }
 0x1ab   :  { %v225_v31 = vmul.f32 %v489_v26, %v217_v28 }
 0x1ac   :  { %v552_v33 = vpop.eup %551 }
 0x1ad   :  { %v327_v35 = vmul.f32 %v552_v33, %v321_v30  ;;  %v233_v39 = vadd.f32 %v490_v34, %v225_v31 }
 0x1af   :  { %v335_v38 = vmul.f32 %v493_v29, %v327_v35 }
 0x1b1   :  { %v343_v41 = vadd.f32 %v494_v16, %v335_v38 }
 0x1b3   :  { %v345_v43 = vadd.f32 %v343_v41, %v233_v39 }
 0x1b5   :  { %v346_v44 = vpack.c.bf16 %v345_v43, %v344_v42 }
 0x1b7   :  { %528 = vmatmul.mubr.msk.bf16.vlgmr.msra.gmra.mxu1 %vm116_vm3, %v346_v44 }
 0x277   :  { %v407_v45 = vpop.f32.mrf.mxu1 }
 0x278   :  { %v408_v46 = vadd.f32 %v495_v25, %v407_v45 }
 0x279   :  { %v529_v47 = vpop.f32.mrf.mxu1 }
 0x27a   :  { %v416_v48 = vsel %vm116_vm3, %v408_v46, 0.0  ;;  %v422_v54 = vmul.f32 %v408_v46, %v408_v46 }
 0x27b   :  { %417 = vadd.xlane.f32.xlu1 %v416_v48  ;;  %v410_v49 = vpop.f32.mrf.mxu1 }
 0x27c   :  { %v411_v50 = vadd.f32 %v495_v25, %v410_v49  ;;  %v424_v56 = vsel %vm116_vm3, %v422_v54, 0.0 }
 0x27d   :  { %v530_v51 = vpop.f32.mrf.mxu1 }
 0x27e   :  { %v419_v52 = vsel %vm116_vm3, %v411_v50, 0.0  ;;  %v423_v53 = vmul.f32 %v411_v50, %v411_v50 }
 0x27f   :  { %420 = vadd.xlane.f32.xlu1 %v419_v52 }
 0x280   :  { %v427_v55 = vsel %vm116_vm3, %v423_v53, 0.0 }
 0x281   :  { %428 = vadd.xlane.f32.xlu0 %v427_v55 }
 0x283   :  { %425 = vadd.xlane.f32.xlu1 %v424_v56 }
 0x304   :  { %v418_v57 = vpop.xlane.xlu1 %417 }
 0x305   :  { %v430_v59 = vmul.f32 0.03125, %v418_v57 }
 0x307   :  { %v434_v2 = vmul.f32 %v430_v59, %v430_v59  ;;  %v440_v12 = vsub.f32 %v408_v46, %v430_v59 }
 0x308   :  { %v421_v58 = vpop.xlane.xlu1 %420 }
 0x309   :  { %v431_v60 = vmul.f32 0.03125, %v421_v58 }
 0x30a   :  { %v429_v61 = vpop.xlane.xlu0 %428 }
 0x30b   :  { %v435_v62 = vmul.f32 %v431_v60, %v431_v60  ;;  %v433_v63 = vmul.f32 0.03125, %v429_v61  ;;  %v441_v9 = vsub.f32 %v411_v50, %v431_v60 }
 0x30c   :  { %v426_v1 = vpop.xlane.xlu1 %425 }
 0x30d   :  { %v437_v3 = vsub.f32 %v433_v63, %v435_v62  ;;  %v432_v0 = vmul.f32 0.03125, %v426_v1 }
 0x30f   :  { %v439_v4 = vmax.f32 %v437_v3, 0.0  ;;  %v436_v5 = vsub.f32 %v432_v0, %v434_v2 }
 0x311   :  { %v443_v6 = vadd.f32 1e-12, %v439_v4  ;;  %v438_v7 = vmax.f32 %v436_v5, 0.0 }
 0x313   :  { %553 = vrsqrt.f32 %v443_v6  ;;  %v442_v8 = vadd.f32 1e-12, %v438_v7 }
 0x315   :  { %555 = vrsqrt.f32 %v442_v8 }
 0x320   :  { %v554_v10 = vpop.eup %553 }
 0x321   :  { %v447_v13 = vmul.f32 %v554_v10, %v441_v9 }
 0x322   :  { %v556_v14 = vpop.eup %555 }
 0x323   :  { %v446_v17 = vmul.f32 %v556_v14, %v440_v12  ;;  %v455_v18 = vmul.f32 %v499_v11, %v447_v13 }
 0x325   :  { %v454_v19 = vmul.f32 %v499_v11, %v446_v17  ;;  %v463_v20 = vadd.f32 %v500_v15, %v455_v18 }
 0x327   :  { %v462_v21 = vadd.f32 %v500_v15, %v454_v19  ;;  %465 = vst.msk [vmem:[#allocation8 + $0x8] sm:$0xff] %vm116_vm3, %v463_v20 }
 0x329   :  { %464 = vst.msk [vmem:[#allocation8] sm:$0xff] %vm116_vm3, %v462_v21 }
 0x32a   :  { %628 = shalt.err (!%p625_p5)
}
 0x32b   :  { %s650_s15 = smov 128   ;;  %s651_s0 = smov 8  }
 0x32c   :  { %477 = dma.vmem_to_hbm [thread:$0]  %s472_s8, 256, %s864_s16, [#allocation4], %s650_s15, %s650_s15, %s651_s0  }
 0x32d   :  { %641 = dma.done.wait [#allocation4], 256  }
 0x32e   :  { %642 = vsyncadd [#allocation4], 4294967040 }
 0x32f   :  { %481 = vsyncpa [#allocation3], 1 }
 0x330   :  { %482 = vsyncpa [#allocation6], 1 }
 0x331   :  { %483 = vsyncpa [#allocation4], 1 }

</bundles_post_ra>
